<compile_context>
chip_gen: v7x
topology: tpu7x:2x2x1
jax: 0.10.0
libtpu: 0.0.40
codegen_flags: <defaults>
</compile_context>

<pallas_src>
import math
import functools

import jax
import jax.numpy as jnp
from jax import lax
from jax.experimental import pallas as pl
from jax.experimental.pallas import tpu as pltpu


def _round_up(x, m):
    return ((x + m - 1) // m) * m


# ---------------------------------------------------------------------------
# Path 1: DMA row gather (table stays in HBM).  Scales to any vocab size.
# ---------------------------------------------------------------------------
def _gather_embed_kernel(tok_ref, table_hbm, out_ref, sem, *,
                         scale, token_block, unroll):
    # tok_ref:   (N_pad,) int32 in SMEM (scalar prefetch)
    # table_hbm: (V, E)   embedding table left in HBM (pl.ANY), no auto-DMA
    # out_ref:   (TB, E)  output tile (VMEM, auto-pipelined); rows are DMA'd
    #                     straight into it, then scaled in place.
    # sem:       scalar DMA semaphore shared by all row copies of this block
    base = pl.program_id(0) * token_block
    n_groups = token_block // unroll

    # Issue all row-gather DMAs for this block.  Each copy is tiny (E*itemsize
    # bytes), so the kernel is descriptor-issue bound: unroll `unroll` rows per
    # loop iteration so the SMEM id loads, address math and descriptor pushes
    # of adjacent rows co-issue across the scalar + vector-misc slots.
    @pl.loop(0, n_groups)
    def _(g):
        row0 = pl.multiple_of(g * unroll, unroll)
        for u in range(unroll):
            t = row0 + u
            tok = tok_ref[base + t]
            pltpu.make_async_copy(table_hbm.at[pl.ds(tok, 1), :],
                                  out_ref.at[pl.ds(t, 1), :],
                                  sem).start()

    # Single bulk wait: every row copy signals `sem` with one row's bytes and
    # all rows are equal-sized, so one wait sized for the whole (TB, E) tile
    # accounts for exactly TB completions (replaces TB per-row waits).
    pltpu.make_async_copy(out_ref, out_ref, sem).wait()

    # Scale in place (no extra rows scratch / VMEM->VMEM copy).
    out_ref[...] = (out_ref[...].astype(jnp.float32) * scale).astype(out_ref.dtype)


# ---------------------------------------------------------------------------
# Path 2: one-hot @ table on the MXU (tiny vocab only; table resident in VMEM).
# ---------------------------------------------------------------------------
def _onehot_embed_kernel(tok_ref, table_ref, out_ref, acc_ref, *, scale, k_chunk):
    tok = tok_ref[...]                                    # (TB, 1) int32
    tb = tok.shape[0]
    V, E = table_ref.shape

    acc_ref[...] = jnp.zeros_like(acc_ref)
    # Chunk the contraction over V so the live one-hot stays tiny (<= TB x 128)
    # instead of a (TB, V) slab that blows past the 64-vreg register file.
    for c in range(0, V, k_chunk):
        size = min(k_chunk, V - c)
        cols = lax.broadcasted_iota(jnp.int32, (tb, size), 1) + c
        onehot = (tok == cols).astype(table_ref.dtype)
        acc_ref[...] += jnp.dot(onehot, table_ref[pl.ds(c, size), :],
                                preferred_element_type=jnp.float32,
                                precision=lax.Precision.HIGHEST)
    out_ref[...] = (acc_ref[...] * scale).astype(out_ref.dtype)


# ---------------------------------------------------------------------------
# Wrapper
# ---------------------------------------------------------------------------
def token_embedding(tokens, table, *, token_block=1024, method=None):
    """tokens: (B, S) int, table: (V, E) -> (B, S, E) = table[tokens] * sqrt(E)."""
    B, S = tokens.shape
    V, E = table.shape
    N = B * S
    scale = float(math.sqrt(E))
    itemsize = jnp.dtype(table.dtype).itemsize
    table_bytes = V * E * itemsize

    if method is None:
        # One-hot/MXU path only for tables that trivially fit VMEM even on v7x.
        method = "onehot" if (V <= 1024 and 2 * table_bytes <= (8 << 20)) else "gather"
    assert method in ("gather", "onehot")

    n8 = _round_up(max(N, 1), 8)

    if method == "gather":
        # Clamp tb so a single (tb, E) tile is <= 8 MiB: double-buffered output
        # blocks stay well under v7x's 64 MiB VMEM, while the large default
        # token_block (1024) amortizes per-grid-step overhead on v5e/v6e.
        rows_cap = max(8, ((8 << 20) // max(1, E * itemsize)) // 8 * 8)
        tb_max = max(8, min(_round_up(token_block, 8), rows_cap))
    else:
        # Small token blocks for the one-hot path (spill-safe on v5e too).
        tb_max = max(8, min(_round_up(token_block, 8), 256))

    tb_max = min(tb_max, n8)
    grid_n = pl.cdiv(n8, tb_max)
    if grid_n < 2 and n8 >= 16:
        grid_n = 2  # >= 2 grid steps so v7x's two TensorCores both get work
    tb = _round_up(pl.cdiv(n8, grid_n), 8)
    grid_n = pl.cdiv(n8, tb)
    n_pad = grid_n * tb

    # Clamp ids (nn.Embedding would raise on out-of-range; we stay in-bounds)
    # and pad with row 0 (a valid row; padded outputs are sliced off below).
    tok_flat = jnp.clip(tokens.reshape(N).astype(jnp.int32), 0, V - 1)
    if n_pad != N:
        tok_flat = jnp.pad(tok_flat, (0, n_pad - N))

    tile_bytes = tb * E * itemsize

    if method == "gather":
        vmem_limit = min(48 << 20, max(24 << 20, 4 * tile_bytes + (2 << 20)))
        out_flat = pl.pallas_call(
            functools.partial(_gather_embed_kernel, scale=scale,
                              token_block=tb, unroll=8),
            out_shape=jax.ShapeDtypeStruct((n_pad, E), table.dtype),
            grid_spec=pltpu.PrefetchScalarGridSpec(
                num_scalar_prefetch=1,                        # token ids -> SMEM
                grid=(grid_n,),
                in_specs=[pl.BlockSpec(memory_space=pl.ANY)],  # table stays in HBM
                out_specs=pl.BlockSpec((tb, E), lambda i, tok: (i, 0)),
                scratch_shapes=[pltpu.SemaphoreType.DMA(())],
            ),
            compiler_params=pltpu.CompilerParams(
                dimension_semantics=("parallel",),
                vmem_limit_bytes=vmem_limit),
        )(tok_flat, table)
    else:
        k_chunk = min(128, V)
        acc_bytes = tb * E * 4
        vmem_limit = min(48 << 20,
                         max(24 << 20,
                             2 * table_bytes + 4 * tile_bytes + acc_bytes + (4 << 20)))
        out_flat = pl.pallas_call(
            functools.partial(_onehot_embed_kernel, scale=scale, k_chunk=k_chunk),
            out_shape=jax.ShapeDtypeStruct((n_pad, E), table.dtype),
            grid_spec=pltpu.PrefetchScalarGridSpec(
                num_scalar_prefetch=0,
                grid=(grid_n,),
                in_specs=[pl.BlockSpec((tb, 1), lambda i: (i, 0)),
                          pl.BlockSpec((V, E), lambda i: (0, 0))],
                out_specs=pl.BlockSpec((tb, E), lambda i: (i, 0)),
                scratch_shapes=[pltpu.VMEM((tb, E), jnp.float32)],
            ),
            compiler_params=pltpu.CompilerParams(
                dimension_semantics=("parallel",),
                vmem_limit_bytes=vmem_limit),
        )(tok_flat.reshape(n_pad, 1), table)

    return out_flat[:N].reshape(B, S, E)


if __name__ == "__main__":
    k_tab1, k_tok1, k_tab2, k_tok2 = jax.random.split(jax.random.PRNGKey(0), 4)

    # --- Config 1: tiny vocab, shapes consistent with the module ------------
    V1, E1, B1, S1 = 64, 128, 2, 8
    table1 = jax.random.normal(k_tab1, (V1, E1), dtype=jnp.float32)
    tokens1 = jax.random.randint(k_tok1, (B1, S1), 0, V1, dtype=jnp.int32)
    ref1 = jnp.take(table1, tokens1, axis=0) * math.sqrt(E1)

    out_g1 = jax.block_until_ready(token_embedding(tokens1, table1, method="gather"))
    assert out_g1.shape == (B1, S1, E1)
    assert jnp.allclose(out_g1, ref1, atol=1e-6, rtol=1e-6), "gather path mismatch (cfg1)"

    out_m1 = jax.block_until_ready(token_embedding(tokens1, table1, method="onehot"))
    assert jnp.allclose(out_m1, ref1, atol=1e-3, rtol=1e-3), "one-hot path mismatch (cfg1)"

    # --- Config 2: bigger vocab, N not a multiple of the block (padding) ----
    V2, E2, B2, S2 = 1024, 128, 3, 50            # N = 150 -> padded, multi-step grid
    table2 = jax.random.normal(k_tab2, (V2, E2), dtype=jnp.float32)
    tokens2 = jax.random.randint(k_tok2, (B2, S2), 0, V2, dtype=jnp.int32)
    ref2 = jnp.take(table2, tokens2, axis=0) * math.sqrt(E2)

    out_g2 = jax.block_until_ready(
        token_embedding(tokens2, table2, method="gather", token_block=64))
    assert jnp.allclose(out_g2, ref2, atol=1e-6, rtol=1e-6), "gather path mismatch (cfg2)"

    out_a2 = jax.block_until_ready(token_embedding(tokens2, table2))
    assert jnp.allclose(out_a2, ref2, atol=1e-3, rtol=1e-3), "auto path mismatch (cfg2)"

    print("KERNEL_OK")
</pallas_src>

<mosaic_0001>
module attributes {stable_mosaic.version = 11 : i64} {
  func.func @_gather_embed_kernel(%arg0: i32, %arg1: memref<16xi32, #tpu.memory_space<smem>>, %arg2: memref<64x128xf32, #tpu.memory_space<any>>, %arg3: memref<8x128xf32, #tpu.memory_space<vmem>>, %arg4: memref<!tpu.dma_semaphore, #tpu.memory_space<semaphore_mem>>) attributes {dimension_semantics = [#tpu.dimension_semantics<parallel>], iteration_bounds = array<i64: 2>, scalar_prefetch = 1 : i64, scratch_operands = 1 : i64, tpu.core_type = #tpu.core_type<tc>, window_params = [{}, {transform_indices = @transform_1, window_bounds = array<i64: 8, 128>}]} {
    %c8_i32 = arith.constant 8 : i32
    %0 = arith.muli %arg0, %c8_i32 : i32
    %c0_i32 = arith.constant 0 : i32
    %c1_i32 = arith.constant 1 : i32
    %1 = arith.muli %c0_i32, %c1_i32 : i32
    %c0_i32_0 = arith.constant 0 : i32
    %2 = arith.addi %c0_i32_0, %1 : i32
    %c8_i32_1 = arith.constant 8 : i32
    %3 = arith.muli %2, %c8_i32_1 : i32
    %4 = tpu.assume_multiple %3, 8 : i32
    %c0_i32_2 = arith.constant 0 : i32
    %5 = arith.addi %4, %c0_i32_2 : i32
    %6 = arith.addi %0, %5 : i32
    %7 = arith.index_cast %6 : i32 to index
    %8 = memref.load %arg1[%7] : memref<16xi32, #tpu.memory_space<smem>>
    %c0_i32_3 = arith.constant 0 : i32
    %9 = tpu.memref_slice %arg2[%8, %c0_i32_3] : memref<64x128xf32, #tpu.memory_space<any>> -> memref<1x128xf32, #tpu.memory_space<any>>
    %c0_i32_4 = arith.constant 0 : i32
    %10 = tpu.memref_slice %arg3[%5, %c0_i32_4] : memref<8x128xf32, #tpu.memory_space<vmem>> -> memref<1x128xf32, #tpu.memory_space<vmem>>
    tpu.enqueue_dma source(%9 : memref<1x128xf32, #tpu.memory_space<any>>) target(%10 : memref<1x128xf32, #tpu.memory_space<vmem>>) target_semaphore(%arg4 : memref<!tpu.dma_semaphore, #tpu.memory_space<semaphore_mem>>)
    %c1_i32_5 = arith.constant 1 : i32
    %11 = arith.addi %4, %c1_i32_5 : i32
    %12 = arith.addi %0, %11 : i32
    %13 = arith.index_cast %12 : i32 to index
    %14 = memref.load %arg1[%13] : memref<16xi32, #tpu.memory_space<smem>>
    %c0_i32_6 = arith.constant 0 : i32
    %15 = tpu.memref_slice %arg2[%14, %c0_i32_6] : memref<64x128xf32, #tpu.memory_space<any>> -> memref<1x128xf32, #tpu.memory_space<any>>
    %c0_i32_7 = arith.constant 0 : i32
    %16 = tpu.memref_slice %arg3[%11, %c0_i32_7] : memref<8x128xf32, #tpu.memory_space<vmem>> -> memref<1x128xf32, #tpu.memory_space<vmem>>
    tpu.enqueue_dma source(%15 : memref<1x128xf32, #tpu.memory_space<any>>) target(%16 : memref<1x128xf32, #tpu.memory_space<vmem>>) target_semaphore(%arg4 : memref<!tpu.dma_semaphore, #tpu.memory_space<semaphore_mem>>)
    %c2_i32 = arith.constant 2 : i32
    %17 = arith.addi %4, %c2_i32 : i32
    %18 = arith.addi %0, %17 : i32
    %19 = arith.index_cast %18 : i32 to index
    %20 = memref.load %arg1[%19] : memref<16xi32, #tpu.memory_space<smem>>
    %c0_i32_8 = arith.constant 0 : i32
    %21 = tpu.memref_slice %arg2[%20, %c0_i32_8] : memref<64x128xf32, #tpu.memory_space<any>> -> memref<1x128xf32, #tpu.memory_space<any>>
    %c0_i32_9 = arith.constant 0 : i32
    %22 = tpu.memref_slice %arg3[%17, %c0_i32_9] : memref<8x128xf32, #tpu.memory_space<vmem>> -> memref<1x128xf32, #tpu.memory_space<vmem>>
    tpu.enqueue_dma source(%21 : memref<1x128xf32, #tpu.memory_space<any>>) target(%22 : memref<1x128xf32, #tpu.memory_space<vmem>>) target_semaphore(%arg4 : memref<!tpu.dma_semaphore, #tpu.memory_space<semaphore_mem>>)
    %c3_i32 = arith.constant 3 : i32
    %23 = arith.addi %4, %c3_i32 : i32
    %24 = arith.addi %0, %23 : i32
    %25 = arith.index_cast %24 : i32 to index
    %26 = memref.load %arg1[%25] : memref<16xi32, #tpu.memory_space<smem>>
    %c0_i32_10 = arith.constant 0 : i32
    %27 = tpu.memref_slice %arg2[%26, %c0_i32_10] : memref<64x128xf32, #tpu.memory_space<any>> -> memref<1x128xf32, #tpu.memory_space<any>>
    %c0_i32_11 = arith.constant 0 : i32
    %28 = tpu.memref_slice %arg3[%23, %c0_i32_11] : memref<8x128xf32, #tpu.memory_space<vmem>> -> memref<1x128xf32, #tpu.memory_space<vmem>>
    tpu.enqueue_dma source(%27 : memref<1x128xf32, #tpu.memory_space<any>>) target(%28 : memref<1x128xf32, #tpu.memory_space<vmem>>) target_semaphore(%arg4 : memref<!tpu.dma_semaphore, #tpu.memory_space<semaphore_mem>>)
    %c4_i32 = arith.constant 4 : i32
    %29 = arith.addi %4, %c4_i32 : i32
    %30 = arith.addi %0, %29 : i32
    %31 = arith.index_cast %30 : i32 to index
    %32 = memref.load %arg1[%31] : memref<16xi32, #tpu.memory_space<smem>>
    %c0_i32_12 = arith.constant 0 : i32
    %33 = tpu.memref_slice %arg2[%32, %c0_i32_12] : memref<64x128xf32, #tpu.memory_space<any>> -> memref<1x128xf32, #tpu.memory_space<any>>
    %c0_i32_13 = arith.constant 0 : i32
    %34 = tpu.memref_slice %arg3[%29, %c0_i32_13] : memref<8x128xf32, #tpu.memory_space<vmem>> -> memref<1x128xf32, #tpu.memory_space<vmem>>
    tpu.enqueue_dma source(%33 : memref<1x128xf32, #tpu.memory_space<any>>) target(%34 : memref<1x128xf32, #tpu.memory_space<vmem>>) target_semaphore(%arg4 : memref<!tpu.dma_semaphore, #tpu.memory_space<semaphore_mem>>)
    %c5_i32 = arith.constant 5 : i32
    %35 = arith.addi %4, %c5_i32 : i32
    %36 = arith.addi %0, %35 : i32
    %37 = arith.index_cast %36 : i32 to index
    %38 = memref.load %arg1[%37] : memref<16xi32, #tpu.memory_space<smem>>
    %c0_i32_14 = arith.constant 0 : i32
    %39 = tpu.memref_slice %arg2[%38, %c0_i32_14] : memref<64x128xf32, #tpu.memory_space<any>> -> memref<1x128xf32, #tpu.memory_space<any>>
    %c0_i32_15 = arith.constant 0 : i32
    %40 = tpu.memref_slice %arg3[%35, %c0_i32_15] : memref<8x128xf32, #tpu.memory_space<vmem>> -> memref<1x128xf32, #tpu.memory_space<vmem>>
    tpu.enqueue_dma source(%39 : memref<1x128xf32, #tpu.memory_space<any>>) target(%40 : memref<1x128xf32, #tpu.memory_space<vmem>>) target_semaphore(%arg4 : memref<!tpu.dma_semaphore, #tpu.memory_space<semaphore_mem>>)
    %c6_i32 = arith.constant 6 : i32
    %41 = arith.addi %4, %c6_i32 : i32
    %42 = arith.addi %0, %41 : i32
    %43 = arith.index_cast %42 : i32 to index
    %44 = memref.load %arg1[%43] : memref<16xi32, #tpu.memory_space<smem>>
    %c0_i32_16 = arith.constant 0 : i32
    %45 = tpu.memref_slice %arg2[%44, %c0_i32_16] : memref<64x128xf32, #tpu.memory_space<any>> -> memref<1x128xf32, #tpu.memory_space<any>>
    %c0_i32_17 = arith.constant 0 : i32
    %46 = tpu.memref_slice %arg3[%41, %c0_i32_17] : memref<8x128xf32, #tpu.memory_space<vmem>> -> memref<1x128xf32, #tpu.memory_space<vmem>>
    tpu.enqueue_dma source(%45 : memref<1x128xf32, #tpu.memory_space<any>>) target(%46 : memref<1x128xf32, #tpu.memory_space<vmem>>) target_semaphore(%arg4 : memref<!tpu.dma_semaphore, #tpu.memory_space<semaphore_mem>>)
    %c7_i32 = arith.constant 7 : i32
    %47 = arith.addi %4, %c7_i32 : i32
    %48 = arith.addi %0, %47 : i32
    %49 = arith.index_cast %48 : i32 to index
    %50 = memref.load %arg1[%49] : memref<16xi32, #tpu.memory_space<smem>>
    %c0_i32_18 = arith.constant 0 : i32
    %51 = tpu.memref_slice %arg2[%50, %c0_i32_18] : memref<64x128xf32, #tpu.memory_space<any>> -> memref<1x128xf32, #tpu.memory_space<any>>
    %c0_i32_19 = arith.constant 0 : i32
    %52 = tpu.memref_slice %arg3[%47, %c0_i32_19] : memref<8x128xf32, #tpu.memory_space<vmem>> -> memref<1x128xf32, #tpu.memory_space<vmem>>
    tpu.enqueue_dma source(%51 : memref<1x128xf32, #tpu.memory_space<any>>) target(%52 : memref<1x128xf32, #tpu.memory_space<vmem>>) target_semaphore(%arg4 : memref<!tpu.dma_semaphore, #tpu.memory_space<semaphore_mem>>)
    %c1_i32_20 = arith.constant 1 : i32
    tpu.wait_dma2 semaphore(%arg4 : memref<!tpu.dma_semaphore, #tpu.memory_space<semaphore_mem>>) src(%arg3 : memref<8x128xf32, #tpu.memory_space<vmem>>) dst(%arg3 : memref<8x128xf32, #tpu.memory_space<vmem>>)
    %c0 = arith.constant 0 : index
    %c0_21 = arith.constant 0 : index
    %53 = vector.load %arg3[%c0, %c0_21] : memref<8x128xf32, #tpu.memory_space<vmem>>, vector<8x128xf32>
    %cst = arith.constant 11.3137083 : f32
    %54 = vector.broadcast %cst : f32 to vector<8x128xf32>
    %55 = arith.mulf %53, %54 : vector<8x128xf32>
    %c0_22 = arith.constant 0 : index
    %c0_23 = arith.constant 0 : index
    %56 = vector.load %arg3[%c0_22, %c0_23] : memref<8x128xf32, #tpu.memory_space<vmem>>, vector<8x128xf32>
    tpu.vector_store %arg3[%c0_22, %c0_23], %55 {strides = array<i32>} : memref<8x128xf32, #tpu.memory_space<vmem>>, vector<8x128xf32>,
    return
  }
  func.func @transform_1(%arg0: i32, %arg1: memref<16xi32, #tpu.memory_space<smem>>) -> (i32, i32) {
    %c0_i32 = arith.constant 0 : i32
    %c0_i32_0 = arith.constant 0 : i32
    return %arg0, %c0_i32 : i32, i32
  }
}

</mosaic_0001>

<bundles_post_ra>
// kernel: tpu_custom_call.1
= control target key start
LH: loop header
LB: loop body
LE: loop exit
PB: predicated region body
PF: predicated region fallthrough
CT: control target
= control target key end

     0   :  { %s843_s0 = inlined_call_operand.hbm [shape: s32[16], index: 0, kind: input, shape index: {}]   ;;  %s844_s1 = inlined_call_operand.hbm [shape: f32[64,128], index: 1, kind: input, shape index: {}]   ;;  %s845_s2 = inlined_call_operand.hbm [shape: f32[16,128], index: 2, kind: output, shape index: {}]  }
   0x1   :  { %s329_s11 = scalar_lea.hbm %s843_s0, 16 }
   0x2   :  { %p330_p0 = scmp.ne.s32.totalorder %s843_s0, %s329_s11  ;;  %p333_p1 = scmp.lt.u32.totalorder %s329_s11, %s843_s0 }
   0x4   :  { %p335_p2 = pnand %p333_p1, %p330_p0 }
   0x6   :  { %338 = shalt.err (!%p335_p2)  }
   0x7   :  { %s591_s16 = smov [#allocation4]  }
   0x8   :  { %8 = dma.hbm_to_smem %s843_s0, 16, %s591_s16, [#allocation3] }
   0x9   :  { %571 = dma.done.wait [#allocation3], 16 }
   0xa   :  { %572 = vsyncadd [#allocation3], 4294967280 }
   0xb   :  { %10 = sfence }
   0xc   :  { %11 = vsyncpa [#allocation6], 0 }
   0xd   :  { %13 = vsyncpa [#allocation6 + $0x1], 0  ;;  %s620_s19 = smov 0   ;;  %s622_s20 = smov 0  }
   0xe   :  { %s624_s21 = smov 0  }
   0xf LB: > { %s279_s0 = sadd.s32 4294967295, %s589_s21   ;;  %s637_s22 = sadd.s32 1, %s589_s21   ;;  %s589_s21 = sphi %s624_s21, %s856_s21   ;;  %s585_s20 = sphi %s622_s20, %s855_s20   ;;  %s581_s19 = sphi %s620_s19, %s854_s19  }
  0x10   : > { %s22_s23 = ssub.s32 %s589_s21, %s637_s22  ;;  %s25_s24 = sadd.s32 1, %s585_s20 }
  0x11   : > { %p23_p3 = scmp.eq.s32.totalorder %s22_s23, 0  ;;  %p280_p4 = scmp.ne.s32.totalorder %s22_s23, 0 }
  0x12   : > { %p29_p5 = scmp.eq.s32.totalorder %s589_s21, 1  ;;  %p34_p6 = scmp.ne.s32.totalorder %s585_s20, %s581_s19 }
  0x13   : > { %s646_s25 = scalar_select %p23_p3, %s585_s20, %s25_s24  }
  0x14   : > { %p648_p7 = por %p280_p4, %p29_p5  ;;  %p35_p8 = scmp.eq.s32.totalorder %s279_s0, 1 }
  0x15   : > { %848 = sst [smem:[#allocation28_spill]] %s646_s25  ;;  %p281_p10 = scmp.ge.s32.totalorder %s589_s21, 2 }
  0x16   : > { %p652_p9 = por %p35_p8, %p34_p6  ;;  %s847_s28 = sand.u32 (!%p281_p10), 1, %s585_s20  }
  0x17   : > { %44 = sbr.rel (%p281_p10) target bundleno = 231 (0xe7), region = 12  ;;  %s659_s29 = sshll.u32 (!%p281_p10), %s589_s21, 3 }
  0x18   : > { %s282_s30 = sshll.u32 (!%p281_p10), %s847_s28, 3  ;;  %s54_s3 = sld [smem:[#allocation4 + %s659_s29]] (!%p281_p10) }
  0x19   : > { %s69_s4 = sadd.s32 (!%p281_p10), 1, %s659_s29  ;;  %s665_s5 = scalar_lea.vmem (!%p281_p10), [#allocation5], %s282_s30 }
  0x1a   : > { %s64_s6 = sshll.u32 (!%p281_p10), %s665_s5, 4  ;;  %s668_s7 = sld [smem:[#allocation4 + %s69_s4]] (!%p281_p10)  ;;  %s670_s6 = int_to_ptr.vmem [resolvable:$true] %s64_s6 }
  0x1b   : > { %s241_s8 = scalar_lea.vmem (!%p281_p10), %s665_s5, 1 [#allocation5]  ;;  %s86_s10 = sadd.s32 (!%p281_p10), 2, %s659_s29 }
  0x1c   : > { %s81_s9 = sshll.u32 (!%p281_p10), %s241_s8, 4  ;;  %s676_s11 = sld [smem:[#allocation4 + %s86_s10]] (!%p281_p10)  ;;  %s674_s9 = int_to_ptr.vmem [resolvable:$true] %s81_s9 }
  0x1d   : > { %s244_s13 = scalar_lea.vmem (!%p281_p10), %s665_s5, 2 [#allocation5]  ;;  %s685_s24 = scalar_lea.hbm (!%p281_p10), %s844_s1, 1024 }
  0x1e   : > { %s284_s12 = sshll.u32 %s54_s3, 4  ;;  %s98_s17 = sshll.u32 %s244_s13, 4  ;;  %s706_s17 = int_to_ptr.vmem [resolvable:$true] %s98_s17 }
  0x1f   : > { %s56_s16 = scalar_lea.hbm %s844_s1, %s284_s12 }
  0x20   : > { %s339_s18 = scalar_lea.hbm %s56_s16, 16  ;;  %p342_p12 = scmp.lt.u32.totalorder %s56_s16, %s844_s1 }
  0x21   : > { %p340_p11 = scmp.ne.s32.totalorder %s56_s16, %s339_s18  ;;  %p343_p13 = scmp.lt.u32.totalorder %s685_s24, %s339_s18 }
  0x22   : > { %p345_p1 = scmp.lt.u32.totalorder %s339_s18, %s56_s16 }
  0x23   : > { %p344_p0 = por %p343_p13, %p342_p12 }
  0x25   : > { %p346_p2 = por %p345_p1, %p344_p0 }
  0x27   : > { %p347_p3 = pnand %p346_p2, %p340_p11 }
  0x29   : > { %350 = shalt.err (!%p347_p3)  }
  0x2a   : > { %s351_s3 = scalar_lea.vmem %s670_s6, 16  ;;  %s592_s8 = smov [#allocation5]  }
  0x2b   : > { %p352_p4 = scmp.ne.s32.totalorder %s670_s6, %s351_s3  ;;  %s353_s10 = sshll.u32 %s592_s8, 4  ;;  %s693_s10 = int_to_ptr.vmem [resolvable:$false] %s353_s10 }
  0x2c   : > { %s696_s12 = scalar_lea.vmem %s693_s10, 256  ;;  %p846_p5 = scmp.lt.s32.totalorder %s670_s6, %s693_s10 }
  0x2d   : > { %p357_p6 = scmp.lt.s32.totalorder %s696_s12, %s351_s3 }
  0x2f   : > { %p358_p8 = por %p357_p6, %p846_p5 }
  0x31   : > { %p359_p10 = pnand %p358_p8, %p352_p4 }
  0x33   : > { %362 = shalt.err (!%p359_p10)  }
  0x34   : > { %67 = dma.hbm_to_vmem [thread:$0]  %s56_s16, 16, %s670_s6, [#allocation2] }
  0x35   : > { %s285_s13 = sshll.u32 %s668_s7, 4  ;;  %s103_s0 = sadd.s32 3, %s659_s29 }
  0x36   : > { %s72_s18 = scalar_lea.hbm %s844_s1, %s285_s13 }
  0x37   : > { %s363_s23 = scalar_lea.hbm %s72_s18, 16  ;;  %p366_p12 = scmp.lt.u32.totalorder %s72_s18, %s844_s1 }
  0x38   : > { %p364_p11 = scmp.ne.s32.totalorder %s72_s18, %s363_s23  ;;  %p367_p13 = scmp.lt.u32.totalorder %s685_s24, %s363_s23 }
  0x39   : > { %p369_p1 = scmp.lt.u32.totalorder %s363_s23, %s72_s18 }
  0x3a   : > { %p368_p0 = por %p367_p13, %p366_p12 }
  0x3c   : > { %p370_p2 = por %p369_p1, %p368_p0 }
  0x3e   : > { %p371_p3 = pnand %p370_p2, %p364_p11 }
  0x40   : > { %374 = shalt.err (!%p371_p3)  }
  0x41   : > { %s375_s7 = scalar_lea.vmem %s674_s9, 16  ;;  %p380_p6 = scmp.lt.s32.totalorder %s674_s9, %s693_s10 }
  0x42   : > { %p376_p4 = scmp.ne.s32.totalorder %s674_s9, %s375_s7  ;;  %p381_p8 = scmp.lt.s32.totalorder %s696_s12, %s375_s7 }
  0x44   : > { %p382_p10 = por %p381_p8, %p380_p6 }
  0x46   : > { %p383_p5 = pnand %p382_p10, %p376_p4 }
  0x48   : > { %386 = shalt.err (!%p383_p5)  }
  0x49   : > { %84 = dma.hbm_to_vmem [thread:$0]  %s72_s18, 16, %s674_s9, [#allocation2] }
  0x4a   : > { %s286_s16 = sshll.u32 %s676_s11, 4  ;;  %s723_s3 = sld [smem:[#allocation4 + %s103_s0]] }
  0x4b   : > { %s89_s14 = scalar_lea.hbm %s844_s1, %s286_s16  ;;  %s247_s15 = scalar_lea.vmem %s665_s5, 3 [#allocation5] }
  0x4c   : > { %s387_s23 = scalar_lea.hbm %s89_s14, 16  ;;  %p390_p12 = scmp.lt.u32.totalorder %s89_s14, %s844_s1 }
  0x4d   : > { %p388_p11 = scmp.ne.s32.totalorder %s89_s14, %s387_s23  ;;  %p391_p5 = scmp.lt.u32.totalorder %s685_s24, %s387_s23 }
  0x4e   : > { %p393_p0 = scmp.lt.u32.totalorder %s387_s23, %s89_s14 }
  0x4f   : > { %p392_p13 = por %p391_p5, %p390_p12 }
  0x51   : > { %p394_p1 = por %p393_p0, %p392_p13 }
  0x53   : > { %p395_p2 = pnand %p394_p1, %p388_p11 }
  0x55   : > { %398 = shalt.err (!%p395_p2)  }
  0x56   : > { %s399_s9 = scalar_lea.vmem %s706_s17, 16  ;;  %p404_p4 = scmp.lt.s32.totalorder %s706_s17, %s693_s10 }
  0x57   : > { %p400_p3 = scmp.ne.s32.totalorder %s706_s17, %s399_s9  ;;  %p405_p6 = scmp.lt.s32.totalorder %s696_s12, %s399_s9 }
  0x59   : > { %p406_p8 = por %p405_p6, %p404_p4 }
  0x5b   : > { %p407_p10 = pnand %p406_p8, %p400_p3 }
  0x5d   : > { %410 = shalt.err (!%p407_p10)  }
  0x5e   : > { %101 = dma.hbm_to_vmem [thread:$0]  %s89_s14, 16, %s706_s17, [#allocation2] }
  0x5f   : > { %s115_s11 = sshll.u32 %s247_s15, 4  ;;  %s120_s18 = sadd.s32 4, %s659_s29  ;;  %s116_s11 = int_to_ptr.vmem [resolvable:$true] %s115_s11 }
  0x60   : > { %s121_s0 = sld [smem:[#allocation4 + %s120_s18]]  ;;  %s250_s7 = scalar_lea.vmem %s665_s5, 4 [#allocation5] }
  0x61   : > { %s137_s16 = sadd.s32 5, %s659_s29  ;;  %s287_s8 = sshll.u32 %s723_s3, 4 }
  0x62   : > { %s132_s13 = sshll.u32 %s250_s7, 4  ;;  %s106_s4 = scalar_lea.hbm %s844_s1, %s287_s8  ;;  %s746_s13 = int_to_ptr.vmem [resolvable:$true] %s132_s13 }
  0x63   : > { %s411_s9 = scalar_lea.hbm %s106_s4, 16  ;;  %p414_p12 = scmp.lt.u32.totalorder %s106_s4, %s844_s1 }
  0x64   : > { %p412_p11 = scmp.ne.s32.totalorder %s106_s4, %s411_s9  ;;  %p415_p5 = scmp.lt.u32.totalorder %s685_s24, %s411_s9 }
  0x65   : > { %p417_p0 = scmp.lt.u32.totalorder %s411_s9, %s106_s4 }
  0x66   : > { %p416_p13 = por %p415_p5, %p414_p12 }
  0x68   : > { %p418_p1 = por %p417_p0, %p416_p13 }
  0x6a   : > { %p419_p2 = pnand %p418_p1, %p412_p11 }
  0x6c   : > { %422 = shalt.err (!%p419_p2)  }
  0x6d   : > { %s423_s17 = scalar_lea.vmem %s116_s11, 16  ;;  %p428_p4 = scmp.lt.s32.totalorder %s116_s11, %s693_s10 }
  0x6e   : > { %p424_p3 = scmp.ne.s32.totalorder %s116_s11, %s423_s17  ;;  %p429_p6 = scmp.lt.s32.totalorder %s696_s12, %s423_s17 }
  0x70   : > { %p430_p8 = por %p429_p6, %p428_p4 }
  0x72   : > { %p431_p10 = pnand %p430_p8, %p424_p3 }
  0x74   : > { %434 = shalt.err (!%p431_p10)  }
  0x75   : > { %118 = dma.hbm_to_vmem [thread:$0]  %s106_s4, 16, %s116_s11, [#allocation2] }
  0x76   : > { %s754_s25 = sld [smem:[#allocation4 + %s137_s16]]  ;;  %s253_s28 = scalar_lea.vmem %s665_s5, 5 [#allocation5] }
  0x77   : > { %s288_s3 = sshll.u32 %s121_s0, 4  ;;  %s149_s7 = sshll.u32 %s253_s28, 4  ;;  %s150_s7 = int_to_ptr.vmem [resolvable:$true] %s149_s7 }
  0x78   : > { %s123_s18 = scalar_lea.hbm %s844_s1, %s288_s3 }
  0x79   : > { %s435_s8 = scalar_lea.hbm %s123_s18, 16  ;;  %p438_p12 = scmp.lt.u32.totalorder %s123_s18, %s844_s1 }
  0x7a   : > { %p436_p11 = scmp.ne.s32.totalorder %s123_s18, %s435_s8  ;;  %p439_p5 = scmp.lt.u32.totalorder %s685_s24, %s435_s8 }
  0x7b   : > { %p441_p0 = scmp.lt.u32.totalorder %s435_s8, %s123_s18 }
  0x7c   : > { %p440_p13 = por %p439_p5, %p438_p12 }
  0x7e   : > { %p442_p1 = por %p441_p0, %p440_p13 }
  0x80   : > { %p443_p2 = pnand %p442_p1, %p436_p11 }
  0x82   : > { %446 = shalt.err (!%p443_p2)  }
  0x83   : > { %s447_s11 = scalar_lea.vmem %s746_s13, 16  ;;  %p452_p4 = scmp.lt.s32.totalorder %s746_s13, %s693_s10 }
  0x84   : > { %p448_p3 = scmp.ne.s32.totalorder %s746_s13, %s447_s11  ;;  %p453_p6 = scmp.lt.s32.totalorder %s696_s12, %s447_s11 }
  0x86   : > { %p454_p8 = por %p453_p6, %p452_p4 }
  0x88   : > { %p455_p10 = pnand %p454_p8, %p448_p3 }
  0x8a   : > { %458 = shalt.err (!%p455_p10)  }
  0x8b   : > { %135 = dma.hbm_to_vmem [thread:$0]  %s123_s18, 16, %s746_s13, [#allocation2] }
  0x8c   : > { %s154_s0 = sadd.s32 6, %s659_s29  ;;  %s256_s16 = scalar_lea.vmem %s665_s5, 6 [#allocation5] }
  0x8d   : > { %s155_s4 = sld [smem:[#allocation4 + %s154_s0]]  ;;  %s289_s9 = sshll.u32 %s754_s25, 4 }
  0x8e   : > { %s166_s17 = sshll.u32 %s256_s16, 4  ;;  %s140_s14 = scalar_lea.hbm %s844_s1, %s289_s9  ;;  %s167_s17 = int_to_ptr.vmem [resolvable:$true] %s166_s17 }
  0x8f   : > { %s171_s15 = sadd.s32 7, %s659_s29  ;;  %s459_s8 = scalar_lea.hbm %s140_s14, 16 }
  0x90   : > { %p460_p11 = scmp.ne.s32.totalorder %s140_s14, %s459_s8  ;;  %p462_p12 = scmp.lt.u32.totalorder %s140_s14, %s844_s1 }
  0x91   : > { %p463_p5 = scmp.lt.u32.totalorder %s685_s24, %s459_s8  ;;  %p465_p0 = scmp.lt.u32.totalorder %s459_s8, %s140_s14 }
  0x93   : > { %p464_p13 = por %p463_p5, %p462_p12 }
  0x95   : > { %p466_p1 = por %p465_p0, %p464_p13 }
  0x97   : > { %p467_p2 = pnand %p466_p1, %p460_p11 }
  0x99   : > { %470 = shalt.err (!%p467_p2)  }
  0x9a   : > { %s471_s13 = scalar_lea.vmem %s150_s7, 16  ;;  %p476_p4 = scmp.lt.s32.totalorder %s150_s7, %s693_s10 }
  0x9b   : > { %p472_p3 = scmp.ne.s32.totalorder %s150_s7, %s471_s13  ;;  %p477_p6 = scmp.lt.s32.totalorder %s696_s12, %s471_s13 }
  0x9d   : > { %p478_p8 = por %p477_p6, %p476_p4 }
  0x9f   : > { %p479_p10 = pnand %p478_p8, %p472_p3 }
  0xa1   : > { %482 = shalt.err (!%p479_p10)  }
  0xa2   : > { %152 = dma.hbm_to_vmem [thread:$0]  %s140_s14, 16, %s150_s7, [#allocation2] }
  0xa3   : > { %s172_s29 = sld [smem:[#allocation4 + %s171_s15]]  ;;  %s259_s25 = scalar_lea.vmem %s665_s5, 7 [#allocation5] }
  0xa4   : > { %s290_s18 = sshll.u32 %s155_s4, 4  ;;  %s183_s11 = sshll.u32 %s259_s25, 4  ;;  %s184_s11 = int_to_ptr.vmem [resolvable:$true] %s183_s11 }
  0xa5   : > { %s157_s9 = scalar_lea.hbm %s844_s1, %s290_s18 }
  0xa6   : > { %s483_s28 = scalar_lea.hbm %s157_s9, 16  ;;  %p486_p12 = scmp.lt.u32.totalorder %s157_s9, %s844_s1 }
  0xa7   : > { %p484_p11 = scmp.ne.s32.totalorder %s157_s9, %s483_s28  ;;  %p487_p5 = scmp.lt.u32.totalorder %s685_s24, %s483_s28 }
  0xa8   : > { %p489_p0 = scmp.lt.u32.totalorder %s483_s28, %s157_s9 }
  0xa9   : > { %p488_p13 = por %p487_p5, %p486_p12 }
  0xab   : > { %p490_p1 = por %p489_p0, %p488_p13 }
  0xad   : > { %p491_p2 = pnand %p490_p1, %p484_p11 }
  0xaf   : > { %494 = shalt.err (!%p491_p2)  }
  0xb0   : > { %s495_s7 = scalar_lea.vmem %s167_s17, 16  ;;  %p500_p4 = scmp.lt.s32.totalorder %s167_s17, %s693_s10 }
  0xb1   : > { %p496_p3 = scmp.ne.s32.totalorder %s167_s17, %s495_s7  ;;  %p501_p6 = scmp.lt.s32.totalorder %s696_s12, %s495_s7 }
  0xb3   : > { %p502_p8 = por %p501_p6, %p500_p4 }
  0xb5   : > { %p503_p10 = pnand %p502_p8, %p496_p3 }
  0xb7   : > { %506 = shalt.err (!%p503_p10)  }
  0xb8   : > { %169 = dma.hbm_to_vmem [thread:$0]  %s157_s9, 16, %s167_s17, [#allocation2] }
  0xb9   : > { %s291_s4 = sshll.u32 %s172_s29, 4 }
  0xba   : > { %s174_s23 = scalar_lea.hbm %s844_s1, %s291_s4 }
  0xbb   : > { %s507_s30 = scalar_lea.hbm %s174_s23, 16  ;;  %p510_p12 = scmp.lt.u32.totalorder %s174_s23, %s844_s1 }
  0xbc   : > { %p508_p11 = scmp.ne.s32.totalorder %s174_s23, %s507_s30  ;;  %p511_p5 = scmp.lt.u32.totalorder %s685_s24, %s507_s30 }
  0xbd   : > { %p513_p0 = scmp.lt.u32.totalorder %s507_s30, %s174_s23 }
  0xbe   : > { %p512_p13 = por %p511_p5, %p510_p12 }
  0xc0   : > { %p514_p1 = por %p513_p0, %p512_p13 }
  0xc2   : > { %p515_p2 = pnand %p514_p1, %p508_p11 }
  0xc4   : > { %518 = shalt.err (!%p515_p2)  }
  0xc5   : > { %s519_s17 = scalar_lea.vmem %s184_s11, 16  ;;  %p524_p4 = scmp.lt.s32.totalorder %s184_s11, %s693_s10 }
  0xc6   : > { %p520_p3 = scmp.ne.s32.totalorder %s184_s11, %s519_s17  ;;  %p525_p6 = scmp.lt.s32.totalorder %s696_s12, %s519_s17 }
  0xc8   : > { %p526_p8 = por %p525_p6, %p524_p4 }
  0xca   : > { %p527_p10 = pnand %p526_p8, %p520_p3 }
  0xcc   : > { %530 = shalt.err (!%p527_p10)  }
  0xcd   : > { %186 = dma.hbm_to_vmem [thread:$0]  %s174_s23, 16, %s184_s11, [#allocation2] }
  0xce   : > { %573 = dma.done.wait [#allocation2], 128 }
  0xcf   : > { %574 = vsyncadd [#allocation2], 4294967168  ;;  %s293_s24 = sshll.u32 %s589_s21, 7  ;;  %v190_v0 = vld [vmem:[%s665_s5] sm:$0xff]  ;;  %s851_s11 = sand.u32 1, %s585_s20  }
  0xd0   : > { %v191_v1 = vmul.f32 11.313708, %v190_v0  ;;  %s205_s0 = scalar_lea.hbm %s845_s2, %s293_s24  ;;  %s194_s16 = scalar_lea.sflag [#allocation6], %s851_s11 }
  0xd1   : > { %s531_s9 = scalar_lea.vmem %s670_s6, 128  ;;  %p852_p0 = scmp.lt.s32.totalorder %s670_s6, %s693_s10 }
  0xd2   : > { %192 = vst [vmem:[%s665_s5] sm:$0xff] %v191_v1  ;;  %p532_p11 = scmp.ne.s32.totalorder %s670_s6, %s531_s9  ;;  %p539_p13 = scmp.lt.s32.totalorder %s696_s12, %s531_s9 }
  0xd4   : > { %p533_p12 = pnand %p532_p11, %p648_p7  ;;  %p540_p1 = por %p539_p13, %p852_p0 }
  0xd6   : > { %p534_p5 = pneg %p533_p12 }
  0xd8   : > { %p541_p2 = pnand %p540_p1, %p534_p5 }
  0xda   : > { %544 = shalt.err (!%p541_p2)
}
  0xdb   : > { %s545_s28 = scalar_lea.hbm %s205_s0, 128  ;;  %s549_s8 = scalar_lea.hbm %s845_s2, 256 }
  0xdc   : > { %p546_p3 = scmp.ne.s32.totalorder %s205_s0, %s545_s28  ;;  %p550_p8 = scmp.lt.u32.totalorder %s205_s0, %s845_s2 }
  0xdd   : > { %p551_p10 = scmp.lt.u32.totalorder %s549_s8, %s545_s28  ;;  %p553_p12 = scmp.lt.u32.totalorder %s545_s28, %s205_s0 }
  0xde   : > { %p547_p4 = pnand %p546_p3, %p648_p7 }
  0xdf   : > { %p552_p11 = por %p551_p10, %p550_p8 }
  0xe0   : > { %p548_p6 = pneg %p547_p4 }
  0xe1   : > { %p554_p13 = por %p553_p12, %p552_p11 }
  0xe3   : > { %p555_p5 = pnand %p554_p13, %p548_p6 }
  0xe5   : > { %558 = shalt.err (!%p555_p5)
}
  0xe6   : > { %297 = dma.vmem_to_hbm [thread:$0]  (%p648_p7), %s670_s6, 128, %s205_s0, %s194_s16  }
  0xe7 PF: > { %p303_p0 = scmp.ge.s32.totalorder %s589_s21, 1  ;;  %s219_s10 = sand.u32 1, %s581_s19  }
  0xe8   : > { %s220_s12 = scalar_lea.sflag [#allocation6], %s219_s10 }
  0xe9   : > { %p300_p1 = pnand %p303_p0, %p652_p9 }
  0xeb   : > { %576 = dma.done.wait (!%p300_p1), %s220_s12, 128  }
  0xec   : > { %578 = vsyncadd (!%p300_p1), %s220_s12, 4294967168  ;;  %s853_s14 = sld [smem:[#allocation28_spill]]  ;;  %p16_p2 = scmp.ge.s32.totalorder %s637_s22, 3  }
  0xed   : > { %s854_s19 = smov %s585_s20  ;;  %s856_s21 = smov %s637_s22 }
  0xee   :  { %18 = sbr.rel (!%p16_p2) target bundleno = 15 (0xf), region = 91 }
  0xf2   : > { %s855_s20 = smov %s853_s14 }
  0xf5   :  { %225 = vsyncpa [#allocation6], 1 }
  0xf6   :  { %227 = vsyncpa [#allocation6 + $0x1], 1 }
  0xf7   :  { %228 = vsyncmov [#allocation2] }
  0xfa   :  { %s229_s21 = vpop.sfrf %228 }
  0xfb   :  { %p296_p7 = scmp.ne.s32.totalorder %s229_s21, 0 }
  0xfd   :  { %233 = shalt.err (%p296_p7)  }

</bundles_post_ra>
